<compile_context>
chip_gen: v7x
topology: tpu7x:2x2x1
jax: 0.10.0
libtpu: 0.0.40
codegen_flags: <defaults>
</compile_context>

<pallas_src>
import math

import jax
import jax.numpy as jnp
from jax.experimental import pallas as pl
from jax.experimental.pallas import tpu as pltpu


def _fourier_concat_kernel(t_ref, b2_ref, h_ref, out_ref):
    """out = concat([cos(t*B2), sin(t*B2), h], -1), with B2 = 2*pi*B.

    t_ref  : (TN, 1)       time indexes tile
    b2_ref : (1, D/2)      pre-scaled Fourier projection matrix (2*pi*B)
    h_ref  : (TN, H)       node feature tile (pass-through concat)
    out_ref: (TN, D + H)   fused [cos | sin | h] tile
    """
    half = b2_ref.shape[1]
    # VPU broadcast outer product (no MXU): (TN,1) * (1,half) -> (TN,half).
    v_proj = t_ref[...] * b2_ref[...]
    out_ref[:, 0:half] = jnp.cos(v_proj).astype(out_ref.dtype)
    out_ref[:, half:2 * half] = jnp.sin(v_proj).astype(out_ref.dtype)
    out_ref[:, 2 * half:] = h_ref[...].astype(out_ref.dtype)


def fourier_time_embedding_concat(t, h, B, *, tile_n=2048, out_dtype=None):
    """Pallas fused FourierTimeEmbedding + concat.

    Returns (N, embed_dim + hidden) = [cos(2*pi*t@B) | sin(2*pi*t@B) | h].
    """
    n = t.shape[0]
    half = B.shape[1]
    hidden = h.shape[1]
    out_dim = 2 * half + hidden
    if out_dtype is None:
        out_dtype = h.dtype  # keep node features bit-exact by default

    # Fold the 2*pi scale into the constant buffer once, outside the kernel.
    B2 = (2.0 * math.pi) * B.astype(jnp.float32)
    t32 = t.astype(jnp.float32)

    # Node tile: multiple of 8 sublanes; when N allows, make the grid >= 2
    # steps so the "parallel" axis shards across both TensorCores on v7x.
    tile_n = max(8, (tile_n // 8) * 8)
    if n <= 8:
        tn = n  # full-extent block (block dim == array dim, allowed)
    else:
        tn = min(tile_n, 8 * pl.cdiv(pl.cdiv(n, 2), 8))
    grid_n = pl.cdiv(n, tn)

    out_bytes = jnp.dtype(out_dtype).itemsize
    h_bytes = jnp.dtype(h.dtype).itemsize

    out = pl.pallas_call(
        _fourier_concat_kernel,
        out_shape=jax.ShapeDtypeStruct((n, out_dim), out_dtype),
        grid=(grid_n,),
        in_specs=[
            pl.BlockSpec((tn, 1), lambda i: (i, 0)),      # t tile
            pl.BlockSpec((1, half), lambda i: (0, 0)),    # B2 (replicated)
            pl.BlockSpec((tn, hidden), lambda i: (i, 0)),  # h tile
        ],
        out_specs=pl.BlockSpec((tn, out_dim), lambda i: (i, 0)),
        compiler_params=pltpu.CompilerParams(
            dimension_semantics=("parallel",)),
        cost_estimate=pl.CostEstimate(
            flops=n * half,
            transcendentals=2 * n * half,
            bytes_accessed=(n * 4 + half * 4 + n * hidden * h_bytes
                            + n * out_dim * out_bytes),
        ),
    )(t32, B2, h)
    return out


def dynamics_gnn_forward(t, h, original_nodes, perturbed_nodes,
                         edge_index, edge_type, node2graph, *, B):
    """Forward pass of DynamicsGNN.

    Mirrors:
        t = self.time_encoder(t)
        h = torch.cat([t, h], dim=-1)
        h, x = self.transformer(h, ...)
        return (h, x)
    """
    h_cat = fourier_time_embedding_concat(t, h, B)
    # TODO(synk): the `transformer` sub-module has no definition in the
    # provided source, so it has no Pallas translation; features and
    # coordinates pass through.  When it exists, fuse this embedding into its
    # first layer's input-projection kernel to hide the cos/sin under MXU work.
    h_out = h_cat
    x_out = perturbed_nodes
    return h_out, x_out


if __name__ == "__main__":
    key = jax.random.PRNGKey(0)
    k_b, k_t, k_h, k_on, k_pn = jax.random.split(key, 5)

    # Small, module-consistent shapes.
    num_nodes = 16          # num_nodes
    embed_dim = 512         # FourierTimeEmbedding(embed_dim=512) per source
    hidden = 32             # node feature dim
    num_edges = 24
    sigma = 1.0
    input_dim = 1

    # Deterministic parameter init (FourierTimeEmbedding.B buffer).
    B = (jax.random.normal(k_b, (input_dim, embed_dim // 2), dtype=jnp.float32)
         * sigma)

    # Example inputs.
    t = jax.random.uniform(k_t, (num_nodes, 1), dtype=jnp.float32)
    h = jax.random.normal(k_h, (num_nodes, hidden), dtype=jnp.float32)
    original_nodes = jax.random.normal(k_on, (num_nodes, 3), dtype=jnp.float32)
    perturbed_nodes = jax.random.normal(k_pn, (num_nodes, 3), dtype=jnp.float32)
    edge_index = jnp.stack(
        [jnp.arange(num_edges, dtype=jnp.int32) % num_nodes,
         (jnp.arange(num_edges, dtype=jnp.int32) + 1) % num_nodes], axis=0)
    edge_type = jnp.zeros((num_edges,), dtype=jnp.int32)
    node2graph = jnp.zeros((num_nodes,), dtype=jnp.int32)

    h_out, x_out = dynamics_gnn_forward(
        t, h, original_nodes, perturbed_nodes, edge_index, edge_type,
        node2graph, B=B)
    h_out = jax.block_until_ready(h_out)
    x_out = jax.block_until_ready(x_out)

    # Reference check (pure JAX) for the Pallas-implemented portion.
    v_proj = 2.0 * math.pi * (t @ B)
    ref = jnp.concatenate([jnp.cos(v_proj), jnp.sin(v_proj), h], axis=-1)
    assert h_out.shape == (num_nodes, embed_dim + hidden)
    assert h_out.dtype == h.dtype
    assert jnp.allclose(h_out, ref, atol=1e-5, rtol=1e-5)
    assert x_out.shape == (num_nodes, 3)

    print("KERNEL_OK")
</pallas_src>

<mosaic_0001>
module attributes {stable_mosaic.version = 11 : i64} {
  func.func @_fourier_concat_kernel(%arg0: i32, %arg1: memref<8x1xf32, #tpu.memory_space<vmem>>, %arg2: memref<1x256xf32, #tpu.memory_space<vmem>>, %arg3: memref<8x32xf32, #tpu.memory_space<vmem>>, %arg4: memref<8x544xf32, #tpu.memory_space<vmem>>) attributes {dimension_semantics = [#tpu.dimension_semantics<parallel>], iteration_bounds = array<i64: 2>, scalar_prefetch = 0 : i64, scratch_operands = 0 : i64, tpu.core_type = #tpu.core_type<tc>, window_params = [{transform_indices = @transform_0, window_bounds = array<i64: 8, 1>}, {pipeline_mode = #tpu.pipeline_mode<synchronous>, transform_indices = @transform_1, window_bounds = array<i64: 1, 256>}, {transform_indices = @transform_2, window_bounds = array<i64: 8, 32>}, {transform_indices = @transform_3, window_bounds = array<i64: 8, 544>}]} {
    %c0 = arith.constant 0 : index
    %c0_0 = arith.constant 0 : index
    %0 = vector.load %arg1[%c0, %c0_0] : memref<8x1xf32, #tpu.memory_space<vmem>>, vector<8x1xf32>
    %c0_1 = arith.constant 0 : index
    %c0_2 = arith.constant 0 : index
    %1 = vector.load %arg2[%c0_1, %c0_2] : memref<1x256xf32, #tpu.memory_space<vmem>>, vector<1x256xf32>
    %2 = vector.broadcast %0 : vector<8x1xf32> to vector<8x256xf32>
    %3 = vector.broadcast %1 : vector<1x256xf32> to vector<8x256xf32>
    %4 = arith.mulf %2, %3 : vector<8x256xf32>
    %5 = math.cos %4 : vector<8x256xf32>
    %c0_3 = arith.constant 0 : index
    %c0_4 = arith.constant 0 : index
    %6 = vector.load %arg4[%c0_3, %c0_4] : memref<8x544xf32, #tpu.memory_space<vmem>>, vector<8x256xf32>
    tpu.vector_store %arg4[%c0_3, %c0_4], %5 {strides = array<i32>} : memref<8x544xf32, #tpu.memory_space<vmem>>, vector<8x256xf32>,
    %7 = math.sin %4 : vector<8x256xf32>
    %c0_5 = arith.constant 0 : index
    %c256 = arith.constant 256 : index
    %8 = vector.load %arg4[%c0_5, %c256] : memref<8x544xf32, #tpu.memory_space<vmem>>, vector<8x256xf32>
    tpu.vector_store %arg4[%c0_5, %c256], %7 {strides = array<i32>} : memref<8x544xf32, #tpu.memory_space<vmem>>, vector<8x256xf32>,
    %c0_6 = arith.constant 0 : index
    %c0_7 = arith.constant 0 : index
    %9 = vector.load %arg3[%c0_6, %c0_7] : memref<8x32xf32, #tpu.memory_space<vmem>>, vector<8x32xf32>
    %c0_8 = arith.constant 0 : index
    %c512 = arith.constant 512 : index
    %10 = vector.load %arg4[%c0_8, %c512] : memref<8x544xf32, #tpu.memory_space<vmem>>, vector<8x32xf32>
    tpu.vector_store %arg4[%c0_8, %c512], %9 {strides = array<i32>} : memref<8x544xf32, #tpu.memory_space<vmem>>, vector<8x32xf32>,
    return
  }
  func.func @transform_0(%arg0: i32) -> (i32, i32) {
    %c0_i32 = arith.constant 0 : i32
    %c0_i32_0 = arith.constant 0 : i32
    return %arg0, %c0_i32 : i32, i32
  }
  func.func @transform_1(%arg0: i32) -> (i32, i32) {
    %c0_i32 = arith.constant 0 : i32
    %c0_i32_0 = arith.constant 0 : i32
    %c0_i32_1 = arith.constant 0 : i32
    return %c0_i32, %c0_i32_0 : i32, i32
  }
  func.func @transform_2(%arg0: i32) -> (i32, i32) {
    %c0_i32 = arith.constant 0 : i32
    %c0_i32_0 = arith.constant 0 : i32
    return %arg0, %c0_i32 : i32, i32
  }
  func.func @transform_3(%arg0: i32) -> (i32, i32) {
    %c0_i32 = arith.constant 0 : i32
    %c0_i32_0 = arith.constant 0 : i32
    return %arg0, %c0_i32 : i32, i32
  }
}

</mosaic_0001>

<bundles_post_ra>
// kernel: tpu_custom_call.1
= control target key start
LH: loop header
LB: loop body
LE: loop exit
PB: predicated region body
PF: predicated region fallthrough
CT: control target
= control target key end

     0   :  { %8 = vsyncpa [#allocation3], 0  ;;  %s1072_s0 = inlined_call_operand.vmem [shape: f32[16,1], index: 0, kind: input, shape index: {}]   ;;  %s1073_s1 = inlined_call_operand.vmem [shape: f32[1,256], index: 1, kind: input, shape index: {}]   ;;  %s1074_s2 = inlined_call_operand.vmem [shape: f32[16,32], index: 2, kind: input, shape index: {}]   ;;  %s1075_s3 = inlined_call_operand.hbm [shape: f32[16,544], index: 3, kind: output, shape index: {}]  }
   0x1   :  { %10 = vsyncpa [#allocation3 + $0x1], 0  ;;  %s892_s12 = smov 0   ;;  %s894_s13 = smov 0  }
   0x2   :  { %s896_s14 = smov 0   ;;  %s898_s15 = smov 0  }
   0x3 LB: > { %s913_s16 = sadd.s32 4294967295, %s862_s15   ;;  %s710_s17 = sadd.s32 4294967294, %s862_s15   ;;  %s862_s15 = sphi %s898_s15, %s1081_s15   ;;  %s858_s14 = sphi %s896_s14, %s1080_s14   ;;  %s854_s13 = sphi %s894_s13, %s1079_s13   ;;  %s850_s12 = sphi %s892_s12, %s1078_s12  }
   0x4   : > { %s917_s18 = sadd.s32 1, %s862_s15   ;;  %s96_s19 = sadd.s32 1, %s858_s14 }
   0x5   : > { %s93_s20 = ssub.s32 %s862_s15, %s917_s18  ;;  %p106_p0 = scmp.ne.s32.totalorder %s858_s14, %s854_s13 }
   0x6   : > { %p94_p1 = scmp.eq.s32.totalorder %s93_s20, 0  ;;  %p107_p2 = scmp.eq.s32.totalorder %s913_s16, 1 }
   0x7   : > { %p112_p3 = scmp.ne.s32.totalorder %s854_s13, %s850_s12  ;;  %p113_p4 = scmp.eq.s32.totalorder %s710_s17, 1 }
   0x8   : > { %s928_s21 = scalar_select %p94_p1, %s858_s14, %s96_s19  }
   0x9   : > { %p930_p5 = por %p107_p2, %p106_p0  ;;  %p934_p6 = por %p113_p4, %p112_p3 }
   0xa   : > { %p713_p7 = scmp.ge.s32.totalorder %s862_s15, 1  ;;  %p148_p8 = scmp.lt.s32.totalorder %s862_s15, 3 }
   0xc   : > { %p149_p9 = pnand %p713_p7, %p148_p8 }
   0xd   : > { %p175_p10 = scmp.lt.s32.totalorder (!%p149_p9), %s913_s16, 1  ;;  %s172_s24 = sand.u32 (!%p149_p9), 1, %s854_s13   ;;  %v864_v0 = vmov (!%p149_p9), 0   ;;  %vm622_vm0 = vcmask (!%p149_p9), 261120   ;;  %v191_v3 = vlaneseq (!%p149_p9)  ;;  %v184_v7 = vld [vmem:[%s1073_s1] sm:$0x3] (!%p149_p9) }
   0xe   : > { %152 = sbr.rel (%p149_p9) target bundleno = 259 (0x103), region = 32  ;;  %791 = vset.pattern.permute.xlu0 (!%p149_p9), %v864_v0  ;;  %v865_v33 = vmov (!%p149_p9), 683565275   ;;  %v866_v37 = vmov (!%p149_p9), 2475754826   ;;  %s625_s20 = scalar_lea.sflag (!%p149_p9), [#allocation3], %s172_s24 }
   0xf   : > { %s735_s25 = smul.u32 (!%p149_p9), 40, %s172_s24  ;;  %v192_v4 = vshrl.u32 (!%p149_p9), %v191_v3, 7  ;;  %v867_v39 = vmov (!%p149_p9), 2131351028   ;;  %v868_v41 = vmov (!%p149_p9), 2102212464  }
  0x10   : > { %v869_v43 = vmov (!%p149_p9), 920167782   ;;  %v870_v50 = vmov (!%p149_p9), 1326507024   ;;  %s744_s10 = smul.u32 (!%p149_p9), 640, %s913_s16 }
  0x11   : > { %s951_s7 = scalar_lea.vmem (!%p149_p9), [#allocation2], %s735_s25  ;;  %v193_v5 = vsub.s32 (!%p149_p9), 0, %v192_v4  ;;  %v197_v6 = vsub.s32 (!%p149_p9), 1, %v192_v4 }
  0x12   : > { %s639_s11 = sshll.u32 (!%p149_p9), %s951_s7, 4  ;;  %s1026_s19 = scalar_lea.hbm (!%p149_p9), %s1075_s3, %s744_s10  ;;  %s1028_s11 = int_to_ptr.vmem [resolvable:$true] %s639_s11 }
  0x13   : > { %v194_v8 = vrot.slane (!%p149_p9), %v184_v7, %v193_v5  ;;  %v198_v9 = vrot.slane (!%p149_p9), %v184_v7, %v197_v6  ;;  %s800_s25 = scalar_lea.vmem (!%p149_p9), %s1028_s11, 640 }
  0x14   : > { %p801_p11 = scmp.ne.s32.totalorder (!%p149_p9), %s1028_s11, %s800_s25 }
  0x15   : > { %s176_s26 = scalar_select %p175_p10, %s913_s16, 1 }
  0x16   : > { %p802_p12 = pnand %p801_p11, %p930_p5 }
  0x17   : > { %s714_s27 = sshll.u32 %s176_s26, 3  ;;  %s871_s26 = smov [#allocation2]  }
  0x18   : > { %s178_s30 = scalar_lea.vmem %s1072_s0, %s714_s27  ;;  %s182_s6 = scalar_lea.vmem %s1074_s2, %s714_s27 }
  0x19   : > { %v183_v1 = vld [vmem:[%s178_s30] sm:$0xff]  ;;  %p803_p13 = pneg %p802_p12  ;;  %s804_s27 = sshll.u32 %s871_s26, 4  ;;  %s805_s27 = int_to_ptr.vmem [resolvable:$false] %s804_s27 }
  0x1a   : > { %v621_v2 = vld [vmem:[%s182_s6] sm:$0xff]  ;;  %187 = vperm.xlu0 %791, %v183_v1   ;;  %s806_s28 = scalar_lea.vmem %s805_s27, 1280  ;;  %p807_p0 = scmp.lt.s32.totalorder %s1028_s11, %s805_s27 }
  0x1b   : > { %623 = vst.msk [vmem:[%s951_s7 + $0x20] sm:$0xff] %vm622_vm0, %v621_v2  ;;  %p808_p1 = scmp.lt.s32.totalorder %s806_s28, %s800_s25 }
  0x1d   : > { %p809_p2 = por %p808_p1, %p807_p0 }
  0x1f   : > { %p810_p3 = pnand %p809_p2, %p803_p13 }
  0x99   : > { %v188_v10 = vpop.permute.xlu0 %187 }
  0x9a   : > { %v957_v11 = vmul.f32 %v194_v8, %v188_v10  ;;  %v959_v12 = vmul.f32 %v198_v9, %v188_v10 }
  0x9c   : > { %v203_v13 = vand.u32 2147483647, %v957_v11  ;;  %v206_v14 = vand.u32 2139095040, %v957_v11  ;;  %v309_v15 = vand.u32 2139095040, %v959_v12  ;;  %v306_v18 = vand.u32 2147483647, %v959_v12 }
  0x9d   : > { %vm205_vm15 = vcmp.lt.s32.totalorder %v957_v11, 0 }
  0x9e   : > { %v207_v16 = vshrl.u32 %v206_v14, 23  ;;  %v210_v17 = vand.u32 8388607, %v203_v13  ;;  %v310_v19 = vshrl.u32 %v309_v15, 23  ;;  %v969_v24 = vand.u32 8388607, %v306_v18 }
  0x9f   : > { %vm204_vm0 = vcmp.le.f32.partialorder %v203_v13, 0.7853982 }
  0xa0   : > { %v716_v20 = vadd.s32 4294967169, %v207_v16  ;;  %v720_v21 = vadd.s32 4294967169, %v310_v19  ;;  %v211_v23 = vor.u32 8388608, %v210_v17  ;;  %v314_v31 = vor.u32 8388608, %v969_v24 }
  0xa2   : > { %v213_v22 = vadd.s32 1, %v716_v20  ;;  %v316_v25 = vadd.s32 1, %v720_v21  ;;  %v971_v30 = vshll.u32 %v211_v23, 8 }
  0xa4   : > { %vm214_vm1 = vcmp.gt.s32.totalorder %v213_v22, 0  ;;  %vm317_vm2 = vcmp.gt.s32.totalorder %v316_v25, 0 }
  0xa5   : > { %v215_v26 = vsel %vm214_vm1, %v213_v22, 0  ;;  %v318_v29 = vsel %vm317_vm2, %v316_v25, 0  ;;  %v354_v25 = vshll.u32 %v314_v31, 8  ;;  %vm308_vm1 = vcmp.lt.s32.totalorder %v959_v12, 0 }
  0xa6   : > { %v216_v27 = vshrl.u32 %v215_v26, 5  ;;  %v217_v28 = vand.u32 31, %v215_v26  ;;  %v974_v35 = vshrl.u32 %v318_v29, 5  ;;  %v320_v36 = vand.u32 31, %v318_v29 }
  0xa7   : > { %vm307_vm2 = vcmp.le.f32.partialorder %v306_v18, 0.7853982 }
  0xa8   : > { %v218_v32 = vsub.s32 32, %v217_v28  ;;  %v220_v34 = vshll.u32 %v865_v33, %v217_v28  ;;  %v223_v38 = vshll.u32 %v866_v37, %v217_v28  ;;  %v226_v40 = vshll.u32 %v867_v39, %v217_v28 }
  0xa9   : > { %v229_v42 = vshll.u32 %v868_v41, %v217_v28  ;;  %v232_v44 = vshll.u32 %v869_v43, %v217_v28  ;;  %vm235_vm3 = vcmp.lt.s32.totalorder %v216_v27, 1  ;;  %vm236_vm4 = vcmp.lt.s32.totalorder %v216_v27, 2 }
  0xaa   : > { %v221_v45 = vshrl.u32 %v866_v37, %v218_v32  ;;  %v224_v46 = vshrl.u32 %v867_v39, %v218_v32  ;;  %v227_v47 = vshrl.u32 %v868_v41, %v218_v32  ;;  %v219_v48 = vshrl.u32 %v865_v33, %v218_v32 }
  0xab   : > { %v230_v49 = vshrl.u32 %v869_v43, %v218_v32  ;;  %v233_v51 = vshrl.u32 %v870_v50, %v218_v32  ;;  %v321_v55 = vsub.s32 32, %v320_v36  ;;  %vm237_vm5 = vcmp.lt.s32.totalorder %v216_v27, 3 }
  0xac   : > { %v222_v52 = vor.u32 %v221_v45, %v220_v34  ;;  %v225_v53 = vor.u32 %v224_v46, %v223_v38  ;;  %v228_v54 = vor.u32 %v227_v47, %v226_v40  ;;  %vm238_vm6 = vcmp.lt.s32.totalorder %v216_v27, 4 }
  0xad   : > { %v231_v56 = vor.u32 %v230_v49, %v229_v42  ;;  %v234_v57 = vor.u32 %v233_v51, %v232_v44  ;;  %v323_v1 = vshll.u32 %v865_v33, %v320_v36  ;;  %v324_v4 = vshrl.u32 %v866_v37, %v321_v55 }
  0xae   : > { %v239_v58 = vsel %vm235_vm3, %v219_v48, %v222_v52  ;;  %v240_v59 = vsel %vm238_vm6, %v228_v54, 2102212464  ;;  %v243_v60 = vsel %vm235_vm3, %v222_v52, %v225_v53  ;;  %v247_v61 = vsel %vm235_vm3, %v225_v53, %v228_v54 }
  0xaf   : > { %v241_v62 = vsel %vm237_vm5, %v225_v53, %v240_v59  ;;  %v244_v63 = vsel %vm238_vm6, %v231_v56, 920167782  ;;  %v248_v0 = vsel %vm238_vm6, %v234_v57, 1326507024  ;;  %v326_v5 = vshll.u32 %v866_v37, %v320_v36 }
  0xb0   : > { %v245_v2 = vsel %vm237_vm5, %v228_v54, %v244_v63  ;;  %v249_v3 = vsel %vm237_vm5, %v231_v56, %v248_v0  ;;  %v242_v6 = vsel %vm236_vm4, %v239_v58, %v241_v62  ;;  %v327_v9 = vshrl.u32 %v867_v39, %v321_v55 }
  0xb1   : > { %v246_v7 = vsel %vm236_vm4, %v243_v60, %v245_v2  ;;  %v250_v8 = vsel %vm236_vm4, %v247_v61, %v249_v3  ;;  %v325_v17 = vor.u32 %v324_v4, %v323_v1  ;;  %v329_v20 = vshll.u32 %v867_v39, %v320_v36 }
  0xb2   : > { %v983_v10 = vmul.u32.u64.low %v971_v30, %v250_v8  ;;  %v984_v14 = vmul.u32.u64.high %v971_v30, %v250_v8, %v983_v10  ;;  %v987_v15 = vmul.u32.u64.low %v971_v30, %v246_v7  ;;  %v988_v16 = vmul.u32.u64.high %v971_v30, %v246_v7, %v987_v15 }
  0xb3   : > { %v328_v19 = vor.u32 %v327_v9, %v326_v5  ;;  %v330_v21 = vshrl.u32 %v868_v41, %v321_v55  ;;  %v332_v22 = vshll.u32 %v868_v41, %v320_v36  ;;  %v333_v23 = vshrl.u32 %v869_v43, %v321_v55 }
  0xb4   : > { %v336_v24 = vshrl.u32 %v870_v50, %v321_v55  ;;  %v258_v26 = vmul.u32 %v971_v30, %v242_v6  ;;  %v322_v27 = vshrl.u32 %v865_v33, %v321_v55  ;;  %v335_v29 = vshll.u32 %v869_v43, %v320_v36 }
  0xb5   : > { %v331_v28 = vor.u32 %v330_v21, %v329_v20  ;;  %vm260_vm7 = vc.u32 %v984_v14, %v987_v15  ;;  %v261_v32 = vadd.s32 1, %v988_v16  ;;  %v334_v34 = vor.u32 %v333_v23, %v332_v22 }
  0xb6   : > { %vm338_vm8 = vcmp.lt.s32.totalorder %v974_v35, 1  ;;  %v337_v37 = vor.u32 %v336_v24, %v335_v29  ;;  %vm340_vm9 = vcmp.lt.s32.totalorder %v974_v35, 3  ;;  %vm341_vm10 = vcmp.lt.s32.totalorder %v974_v35, 4 }
  0xb7   : > { %v346_v38 = vsel %vm338_vm8, %v325_v17, %v328_v19  ;;  %v262_v31 = vsel %vm260_vm7, %v261_v32, %v988_v16  ;;  %v343_v39 = vsel %vm341_vm10, %v331_v28, 2102212464  ;;  %v347_v30 = vsel %vm341_vm10, %v334_v34, 920167782 }
  0xb8   : > { %v350_v33 = vsel %vm338_vm8, %v328_v19, %v331_v28  ;;  %v263_v40 = vadd.s32 %v262_v31, %v258_v26  ;;  %vm339_vm11 = vcmp.lt.s32.totalorder %v974_v35, 2  ;;  %v348_v36 = vsel %vm340_vm9, %v331_v28, %v347_v30 }
  0xb9   : > { %v351_v41 = vsel %vm341_vm10, %v337_v37, 1326507024  ;;  %v342_v42 = vsel %vm338_vm8, %v322_v27, %v325_v17  ;;  %v344_v43 = vsel %vm340_vm9, %v328_v19, %v343_v39  ;;  %v349_v44 = vsel %vm339_vm11, %v346_v38, %v348_v36 }
  0xba   : > { %v352_v45 = vsel %vm340_vm9, %v334_v34, %v351_v41  ;;  %v264_v46 = vadd.s32 536870912, %v263_v40  ;;  %v998_v48 = vmul.u32.u64.low %v354_v25, %v349_v44  ;;  %v999_v49 = vmul.u32.u64.high %v354_v25, %v349_v44, %v998_v48 }
  0xbb   : > { %v353_v47 = vsel %vm339_vm11, %v350_v33, %v352_v45  ;;  %v345_v53 = vsel %vm339_vm11, %v342_v42, %v344_v43  ;;  %v259_v5 = vadd.s32 %v987_v15, %v984_v14  ;;  %vm295_vm9 = vweird.f32 %v957_v11 }
  0xbc   : > { %v1001_v50 = vmul.u32.u64.low %v354_v25, %v353_v47  ;;  %v1002_v51 = vmul.u32.u64.high %v354_v25, %v353_v47, %v1001_v50  ;;  %v265_v52 = vshrl.u32 %v264_v46, 30  ;;  %v364_v55 = vadd.s32 1, %v999_v49 }
  0xbd   : > { %v361_v35 = vmul.u32 %v354_v25, %v345_v53 }
  0xbe   : > { %v266_v54 = vshll.u32 %v265_v52, 30  ;;  %vm363_vm12 = vc.u32 %v1002_v51, %v998_v48  ;;  %v362_v26 = vadd.s32 %v998_v48, %v1002_v51  ;;  %v289_v15 = vsub.s32 4, %v265_v52 }
  0xbf   : > { %v365_v57 = vsel %vm363_vm12, %v364_v55, %v999_v49 }
  0xc0   : > { %v267_v56 = vsub.s32 %v263_v40, %v266_v54  ;;  %v366_v58 = vadd.s32 %v365_v57, %v361_v35  ;;  %v290_v30 = vsel %vm205_vm15, %v289_v15, %v265_v52 }
  0xc1   : > { %v292_v36 = vsel %vm204_vm0, 0, %v290_v30 }
  0xc2   : > { %v269_v59 = vsub.s32 0, %v267_v56  ;;  %v367_v60 = vadd.s32 536870912, %v366_v58  ;;  %v504_v45 = vadd.s32 3, %v292_v36  ;;  %v296_v48 = vand.u32 3, %v292_v36 }
  0xc4   : > { %v717_v61 = vmin.u32 %v269_v59, %v267_v56  ;;  %v368_v62 = vshrl.u32 %v367_v60, 30  ;;  %v505_v50 = vand.u32 3, %v504_v45  ;;  %vm298_vm3 = vcmp.eq.s32.totalorder %v296_v48, 0 }
  0xc5   : > { %vm301_vm4 = vcmp.eq.s32.totalorder %v296_v48, 2  ;;  %vm297_vm7 = vcmp.lt.s32.totalorder %v296_v48, 2 }
  0xc6   : > { %v271_v63 = vclz %v717_v61  ;;  %v369_v0 = vshll.u32 %v368_v62, 30  ;;  %v392_v44 = vsub.s32 4, %v368_v62  ;;  %vm510_vm5 = vcmp.eq.s32.totalorder %v505_v50, 2 }
  0xc7   : > { %vm507_vm6 = vcmp.eq.s32.totalorder %v505_v50, 0  ;;  %vm506_vm8 = vcmp.lt.s32.totalorder %v505_v50, 2 }
  0xc8   : > { %v718_v1 = vadd.s32 4294967294, %v271_v63  ;;  %v370_v2 = vsub.s32 %v366_v58, %v369_v0  ;;  %v393_v47 = vsel %vm308_vm1, %v392_v44, %v368_v62 }
  0xc9   : > { %v395_v52 = vsel %vm307_vm2, 0, %v393_v47 }
  0xca   : > { %vm719_vm13 = vcmp.lt.s32.totalorder %v718_v1, 0  ;;  %v372_v4 = vsub.s32 0, %v370_v2  ;;  %v399_v63 = vand.u32 3, %v395_v52 }
  0xcb   : > { %v274_v3 = vsel %vm719_vm13, 0, %v718_v1 }
  0xcc   : > { %v275_v6 = vsub.s32 32, %v274_v3  ;;  %v279_v7 = vsub.s32 4294967266, %v274_v3  ;;  %v721_v8 = vmin.u32 %v372_v4, %v370_v2  ;;  %v276_v9 = vshll.u32 %v267_v56, %v274_v3 }
  0xcd   : > { %v608_v56 = vadd.s32 3, %v395_v52  ;;  %vm404_vm10 = vcmp.eq.s32.totalorder %v399_v63, 2  ;;  %vm401_vm12 = vcmp.eq.s32.totalorder %v399_v63, 0 }
  0xce   : > { %v277_v10 = vshrl.u32 %v259_v5, %v275_v6  ;;  %v280_v16 = vadd.s32 127, %v279_v7  ;;  %v374_v17 = vclz %v721_v8 }
  0xcf   : > { %v609_v0 = vand.u32 3, %v608_v56 }
  0xd0   : > { %v278_v19 = vor.u32 %v277_v10, %v276_v9  ;;  %v281_v20 = vshll.u32 %v280_v16, 23  ;;  %v722_v21 = vadd.s32 4294967294, %v374_v17 }
  0xd1   : > { %vm614_vm11 = vcmp.eq.s32.totalorder %v609_v0, 2  ;;  %vm611_vm13 = vcmp.eq.s32.totalorder %v609_v0, 0 }
  0xd2   : > { %v282_v22 = vor.u32 4788187, %v281_v20  ;;  %vm723_vm14 = vcmp.lt.s32.totalorder %v722_v21, 0  ;;  %v285_v24 = vcvt.s32.f32 %v278_v19 }
  0xd3   : > { %v377_v25 = vsel %vm723_vm14, 0, %v722_v21  ;;  %vm400_vm14 = vcmp.lt.s32.totalorder %v399_v63, 2 }
  0xd4   : > { %v283_v23 = vand.u32 2147483647, %v282_v22  ;;  %v378_v27 = vsub.s32 32, %v377_v25  ;;  %v382_v28 = vsub.s32 4294967266, %v377_v25  ;;  %v379_v29 = vshll.u32 %v370_v2, %v377_v25 }
  0xd6   : > { %v286_v14 = vmul.f32 %v285_v24, %v283_v23  ;;  %v380_v32 = vshrl.u32 %v362_v26, %v378_v27  ;;  %v383_v34 = vadd.s32 127, %v382_v28 }
  0xd8   : > { %v287_v37 = vxor.u32 2147483648, %v286_v14  ;;  %v381_v38 = vor.u32 %v380_v32, %v379_v29  ;;  %v384_v31 = vshll.u32 %v383_v34, 23 }
  0xda   : > { %v288_v39 = vsel %vm205_vm15, %v287_v37, %v286_v14  ;;  %v385_v40 = vor.u32 4788187, %v384_v31  ;;  %v388_v42 = vcvt.s32.f32 %v381_v38  ;;  %vm610_vm15 = vcmp.lt.s32.totalorder %v609_v0, 2 }
  0xdb   : > { %v291_v33 = vsel %vm204_vm0, %v957_v11, %v288_v39  ;;  %vm398_vm0 = vweird.f32 %v959_v12 }
  0xdc   : > { %792 = vcosq.f32 %v291_v33  ;;  %v386_v41 = vand.u32 2147483647, %v385_v40 }
  0xdd   : > { %794 = vsinq.f32 %v291_v33 }
  0xde   : > { %v389_v43 = vmul.f32 %v388_v42, %v386_v41 }
  0xe0   : > { %v390_v46 = vxor.u32 2147483648, %v389_v43 }
  0xe2   : > { %v391_v13 = vsel %vm308_vm1, %v390_v46, %v389_v43 }
  0xe3   : > { %v394_v49 = vsel %vm307_vm2, %v959_v12, %v391_v13 }
  0xe4   : > { %796 = vcosq.f32 %v394_v49 }
  0xe5   : > { %798 = vsinq.f32 %v394_v49 }
  0xe6   : > { %v793_v51 = vpop.eup %792 }
  0xe7   : > { %v795_v53 = vpop.eup %794  ;;  %v302_v54 = vxor.u32 2147483648, %v793_v51 }
  0xe8   : > { %v299_v55 = vxor.u32 2147483648, %v795_v53 }
  0xe9   : > { %v303_v35 = vsel %vm301_vm4, %v302_v54, %v795_v53  ;;  %v512_v18 = vsel %vm510_vm5, %v302_v54, %v795_v53 }
  0xea   : > { %v300_v57 = vsel %vm298_vm3, %v793_v51, %v299_v55  ;;  %v509_v58 = vsel %vm507_vm6, %v793_v51, %v299_v55 }
  0xeb   : > { %v304_v59 = vsel %vm297_vm7, %v300_v57, %v303_v35  ;;  %v513_v60 = vsel %vm506_vm8, %v509_v58, %v512_v18 }
  0xec   : > { %v305_v61 = vsel %vm295_vm9, nan, %v304_v59  ;;  %v514_v62 = vsel %vm295_vm9, nan, %v513_v60 }
  0xed   : > { %409 = vst [vmem:[%s951_s7] sm:$0xff] %v305_v61  ;;  %619 = vst [vmem:[%s951_s7 + $0x10] sm:$0xff] %v514_v62 }
  0xee   : > { %v797_v1 = vpop.eup %796 }
  0xef   : > { %v799_v2 = vpop.eup %798  ;;  %v405_v3 = vxor.u32 2147483648, %v797_v1 }
  0xf0   : > { %v402_v4 = vxor.u32 2147483648, %v799_v2 }
  0xf1   : > { %v406_v11 = vsel %vm404_vm10, %v405_v3, %v799_v2  ;;  %v616_v5 = vsel %vm614_vm11, %v405_v3, %v799_v2 }
  0xf2   : > { %v403_v6 = vsel %vm401_vm12, %v797_v1, %v402_v4  ;;  %v613_v7 = vsel %vm611_vm13, %v797_v1, %v402_v4 }
  0xf3   : > { %v407_v8 = vsel %vm400_vm14, %v403_v6, %v406_v11  ;;  %v617_v9 = vsel %vm610_vm15, %v613_v7, %v616_v5 }
  0xf4   : > { %v408_v10 = vsel %vm398_vm0, nan, %v407_v8  ;;  %v618_v16 = vsel %vm398_vm0, nan, %v617_v9 }
  0xf5   : > { %410 = vst [vmem:[%s951_s7 + $0x8] sm:$0xff] %v408_v10  ;;  %620 = vst [vmem:[%s951_s7 + $0x18] sm:$0xff] %v618_v16 }
  0xf6   : > { %813 = shalt.err (!%p810_p3)
}
  0xf7   : > { %s814_s24 = scalar_lea.hbm %s1026_s19, 640  ;;  %s818_s4 = scalar_lea.hbm %s1075_s3, 1280 }
  0xf8   : > { %p815_p4 = scmp.ne.s32.totalorder %s1026_s19, %s814_s24  ;;  %p819_p9 = scmp.lt.u32.totalorder %s1026_s19, %s1075_s3 }
  0xf9   : > { %p820_p10 = scmp.lt.u32.totalorder %s818_s4, %s814_s24  ;;  %p822_p12 = scmp.lt.u32.totalorder %s814_s24, %s1026_s19 }
  0xfa   : > { %p816_p7 = pnand %p815_p4, %p930_p5 }
  0xfb   : > { %p821_p11 = por %p820_p10, %p819_p9 }
  0xfc   : > { %p817_p8 = pneg %p816_p7 }
  0xfd   : > { %p823_p13 = por %p822_p12, %p821_p11 }
  0xff   : > { %p824_p0 = pnand %p823_p13, %p817_p8 }
 0x101   : > { %827 = shalt.err (!%p824_p0)
}
 0x102   : > { %745 = dma.vmem_to_hbm [thread:$0]  (%p930_p5), %s1028_s11, 640, %s1026_s19, %s625_s20  }
 0x103 PF: > { %p751_p1 = scmp.ge.s32.totalorder %s862_s15, 2  ;;  %s651_s7 = sand.u32 1, %s850_s12  }
 0x104   : > { %s652_s8 = scalar_lea.sflag [#allocation3], %s651_s7 }
 0x105   : > { %p748_p2 = pnand %p751_p1, %p934_p6 }
 0x107   : > { %845 = dma.done.wait (!%p748_p2), %s652_s8, 640  }
 0x108   : > { %847 = vsyncadd (!%p748_p2), %s652_s8, 4294966656  ;;  %p13_p3 = scmp.ge.s32.totalorder %s917_s18, 4   ;;  %s1078_s12 = smov %s854_s13 }
 0x109   : > { %s1079_s13 = smov %s858_s14  ;;  %s1080_s14 = smov %s928_s21 }
 0x10a   : > { %s1081_s15 = smov %s917_s18  ;;  %15 = sbr.rel (!%p13_p3) target bundleno = 3 (0x3), region = 70 }
 0x111   :  { %657 = vsyncpa [#allocation3], 1 }
 0x112   :  { %659 = vsyncpa [#allocation3 + $0x1], 1 }

</bundles_post_ra>
